<compile_context>
chip_gen: v7x
topology: tpu7x:2x2x1
jax: 0.10.0
libtpu: 0.0.40
codegen_flags: <defaults>
</compile_context>

<pallas_src>
import functools

import jax
import jax.numpy as jnp
from jax.experimental import pallas as pl
from jax.experimental.pallas import tpu as pltpu

_LANES = 128                       # lane width of a vreg
_SUBLANES = 8                      # sublane count of a vreg
_MAX_TILE_ROWS = 2048              # 2048 rows * 128 lanes * 4 B = 1 MiB / component
_VMEM_LIMIT_BYTES = 32 * 1024 * 1024
_PALLAS_MIN_POINTS = 100_000       # below this, fused XLA elementwise wins


def _lorenz63_kernel(params_ref, state_ref, out_ref):
    # params_ref: SMEM (3,)            -> [sigma, rho, beta]
    # state_ref : VMEM (3, TR, 128)    -> dense component tiles
    # out_ref   : VMEM (3, TR, 128)
    sigma = params_ref[0]
    rho = params_ref[1]
    beta = params_ref[2]

    x = state_ref[0]   # (TR, 128) dense tile
    y = state_ref[1]
    z = state_ref[2]

    out_ref[0] = sigma * (y - x)
    out_ref[1] = x * (rho - z) - y
    out_ref[2] = x * y - beta * z


def _round_up(n, m):
    return ((n + m - 1) // m) * m


def _lorenz63_jnp(state, sigma, rho, beta):
    x, y, z = state[0], state[1], state[2]
    return jnp.stack([
        sigma * (y - x),
        x * (rho - z) - y,
        x * y - beta * z,
    ])


@functools.partial(jax.jit, static_argnames=("use_pallas",))
def lorenz63_forward(t, state, sigma, rho, beta, use_pallas=None):
    """Pallas equivalent of Lorenz63.forward(t, state).

    `t` is unused (autonomous ODE), kept for API parity with the PyTorch module.
    `state` has leading dimension 3 (x, y, z); any trailing batch dims.
    `use_pallas`: None = auto (Pallas only for large batches), True/False = force.
    """
    del t
    state = jnp.asarray(state, jnp.float32)
    if state.shape[0] != 3:
        raise ValueError(f"state must have leading dim 3, got {state.shape}")
    sigma = jnp.asarray(sigma, jnp.float32)
    rho = jnp.asarray(rho, jnp.float32)
    beta = jnp.asarray(beta, jnp.float32)

    n_points = state.size // 3
    if use_pallas is None:
        use_pallas = n_points >= _PALLAS_MIN_POINTS
    if not use_pallas:
        # Small-batch fast path: pallas_call launch overhead dominates here.
        return _lorenz63_jnp(state, sigma, rho, beta)

    orig_shape = state.shape
    flat = state.reshape(3, -1)
    b = flat.shape[1]

    # Rows of 128 lanes, sublane-aligned.
    rows = _round_up(pl.cdiv(max(b, 1), _LANES), _SUBLANES)
    # Adaptive tile size: smallest grid that respects _MAX_TILE_ROWS, with at
    # least 2 steps when possible so both v7x TensorCores get iterations.
    n_steps = pl.cdiv(rows, _MAX_TILE_ROWS)
    if n_steps == 1 and rows >= 2 * _SUBLANES:
        n_steps = 2
    tile_rows = _round_up(pl.cdiv(rows, n_steps), _SUBLANES)
    n_steps = pl.cdiv(rows, tile_rows)
    rows_padded = tile_rows * n_steps          # excess vs rows: a few sublanes max
    b_padded = rows_padded * _LANES

    if b_padded != b:                          # aligned fast path skips the pad copy
        flat = jnp.pad(flat, ((0, 0), (0, b_padded - b)))
    tiled = flat.reshape(3, rows_padded, _LANES)

    params = jnp.stack([sigma, rho, beta])

    out = pl.pallas_call(
        _lorenz63_kernel,
        out_shape=jax.ShapeDtypeStruct((3, rows_padded, _LANES), jnp.float32),
        grid_spec=pltpu.PrefetchScalarGridSpec(
            num_scalar_prefetch=1,             # params -> SMEM
            grid=(n_steps,),
            in_specs=[
                pl.BlockSpec((3, tile_rows, _LANES), lambda i, p: (0, i, 0)),
            ],
            out_specs=pl.BlockSpec((3, tile_rows, _LANES), lambda i, p: (0, i, 0)),
        ),
        compiler_params=pltpu.CompilerParams(
            dimension_semantics=("parallel",),  # shard batch across TCs (v7x)
            vmem_limit_bytes=_VMEM_LIMIT_BYTES,
        ),
    )(params, tiled)

    out = out.reshape(3, b_padded)
    if b_padded != b:
        out = out[:, :b]                       # drop padded lanes
    return out.reshape(orig_shape)


if __name__ == "__main__":
    # Classic Lorenz-63 parameters (the nn.Parameter initial values).
    sigma, rho, beta = 10.0, 28.0, 8.0 / 3.0
    t = jnp.float32(0.0)

    def reference(state):
        x, y, z = state[0], state[1], state[2]
        return jnp.stack([
            sigma * (y - x),
            x * (rho - z) - y,
            x * y - beta * z,
        ])

    key = jax.random.PRNGKey(0)
    k1, k2, k3 = jax.random.split(key, 3)

    # Small batched state (3, 256): force the Pallas path so the kernel runs.
    state = jax.random.normal(k1, (3, 256), dtype=jnp.float32)
    out = jax.block_until_ready(
        lorenz63_forward(t, state, sigma, rho, beta, use_pallas=True))
    assert out.shape == state.shape and out.dtype == jnp.float32
    assert jnp.allclose(out, reference(state), rtol=1e-6, atol=1e-6)

    # Non-aligned trailing batch dims exercise the padding / unpadding path.
    state2 = jax.random.normal(k2, (3, 4, 50), dtype=jnp.float32)
    out2 = jax.block_until_ready(
        lorenz63_forward(t, state2, sigma, rho, beta, use_pallas=True))
    assert out2.shape == state2.shape
    assert jnp.allclose(out2, reference(state2), rtol=1e-6, atol=1e-6)

    # Multi-step grid (>=2 iterations, adaptive tile) + padding path.
    state3 = jax.random.normal(k3, (3, 3000), dtype=jnp.float32)
    out3 = jax.block_until_ready(
        lorenz63_forward(t, state3, sigma, rho, beta, use_pallas=True))
    assert out3.shape == state3.shape
    assert jnp.allclose(out3, reference(state3), rtol=1e-6, atol=1e-6)

    # Auto mode at small size takes the fused-XLA fast path; same numerics.
    out_fast = jax.block_until_ready(lorenz63_forward(t, state, sigma, rho, beta))
    assert jnp.allclose(out_fast, reference(state), rtol=1e-6, atol=1e-6)

    print("KERNEL_OK")
</pallas_src>

<mosaic_0001>
module attributes {stable_mosaic.version = 11 : i64} {
  func.func @_lorenz63_kernel(%arg0: i32, %arg1: memref<3xf32, #tpu.memory_space<smem>>, %arg2: memref<3x8x128xf32, #tpu.memory_space<vmem>>, %arg3: memref<3x8x128xf32, #tpu.memory_space<vmem>>) attributes {dimension_semantics = [#tpu.dimension_semantics<parallel>], iteration_bounds = array<i64: 1>, scalar_prefetch = 1 : i64, scratch_operands = 0 : i64, tpu.core_type = #tpu.core_type<tc>, window_params = [{transform_indices = @transform_0, window_bounds = array<i64: 3, 8, 128>}, {transform_indices = @transform_1, window_bounds = array<i64: 3, 8, 128>}]} {
    %c0 = arith.constant 0 : index
    %0 = memref.load %arg1[%c0] : memref<3xf32, #tpu.memory_space<smem>>
    %c1 = arith.constant 1 : index
    %1 = memref.load %arg1[%c1] : memref<3xf32, #tpu.memory_space<smem>>
    %c2 = arith.constant 2 : index
    %2 = memref.load %arg1[%c2] : memref<3xf32, #tpu.memory_space<smem>>
    %c0_0 = arith.constant 0 : index
    %c0_1 = arith.constant 0 : index
    %c0_2 = arith.constant 0 : index
    %3 = vector.load %arg2[%c0_0, %c0_1, %c0_2] : memref<3x8x128xf32, #tpu.memory_space<vmem>>, vector<1x8x128xf32>
    %4 = vector.shape_cast %3 : vector<1x8x128xf32> to vector<8x128xf32>
    %c1_3 = arith.constant 1 : index
    %c0_4 = arith.constant 0 : index
    %c0_5 = arith.constant 0 : index
    %5 = vector.load %arg2[%c1_3, %c0_4, %c0_5] : memref<3x8x128xf32, #tpu.memory_space<vmem>>, vector<1x8x128xf32>
    %6 = vector.shape_cast %5 : vector<1x8x128xf32> to vector<8x128xf32>
    %c2_6 = arith.constant 2 : index
    %c0_7 = arith.constant 0 : index
    %c0_8 = arith.constant 0 : index
    %7 = vector.load %arg2[%c2_6, %c0_7, %c0_8] : memref<3x8x128xf32, #tpu.memory_space<vmem>>, vector<1x8x128xf32>
    %8 = vector.shape_cast %7 : vector<1x8x128xf32> to vector<8x128xf32>
    %9 = arith.subf %6, %4 : vector<8x128xf32>
    %10 = vector.broadcast %0 : f32 to vector<8x128xf32>
    %11 = arith.mulf %10, %9 : vector<8x128xf32>
    %c0_9 = arith.constant 0 : index
    %c0_10 = arith.constant 0 : index
    %c0_11 = arith.constant 0 : index
    %12 = vector.load %arg3[%c0_9, %c0_10, %c0_11] : memref<3x8x128xf32, #tpu.memory_space<vmem>>, vector<1x8x128xf32>
    %13 = vector.shape_cast %12 : vector<1x8x128xf32> to vector<8x128xf32>
    %14 = vector.shape_cast %11 : vector<8x128xf32> to vector<1x8x128xf32>
    tpu.vector_store %arg3[%c0_9, %c0_10, %c0_11], %14 {strides = array<i32>} : memref<3x8x128xf32, #tpu.memory_space<vmem>>, vector<1x8x128xf32>,
    %15 = vector.broadcast %1 : f32 to vector<8x128xf32>
    %16 = arith.subf %15, %8 : vector<8x128xf32>
    %17 = arith.mulf %4, %16 : vector<8x128xf32>
    %18 = arith.subf %17, %6 : vector<8x128xf32>
    %c1_12 = arith.constant 1 : index
    %c0_13 = arith.constant 0 : index
    %c0_14 = arith.constant 0 : index
    %19 = vector.load %arg3[%c1_12, %c0_13, %c0_14] : memref<3x8x128xf32, #tpu.memory_space<vmem>>, vector<1x8x128xf32>
    %20 = vector.shape_cast %19 : vector<1x8x128xf32> to vector<8x128xf32>
    %21 = vector.shape_cast %18 : vector<8x128xf32> to vector<1x8x128xf32>
    tpu.vector_store %arg3[%c1_12, %c0_13, %c0_14], %21 {strides = array<i32>} : memref<3x8x128xf32, #tpu.memory_space<vmem>>, vector<1x8x128xf32>,
    %22 = arith.mulf %4, %6 : vector<8x128xf32>
    %23 = vector.broadcast %2 : f32 to vector<8x128xf32>
    %24 = arith.mulf %23, %8 : vector<8x128xf32>
    %25 = arith.subf %22, %24 : vector<8x128xf32>
    %c2_15 = arith.constant 2 : index
    %c0_16 = arith.constant 0 : index
    %c0_17 = arith.constant 0 : index
    %26 = vector.load %arg3[%c2_15, %c0_16, %c0_17] : memref<3x8x128xf32, #tpu.memory_space<vmem>>, vector<1x8x128xf32>
    %27 = vector.shape_cast %26 : vector<1x8x128xf32> to vector<8x128xf32>
    %28 = vector.shape_cast %25 : vector<8x128xf32> to vector<1x8x128xf32>
    tpu.vector_store %arg3[%c2_15, %c0_16, %c0_17], %28 {strides = array<i32>} : memref<3x8x128xf32, #tpu.memory_space<vmem>>, vector<1x8x128xf32>,
    return
  }
  func.func @transform_0(%arg0: i32, %arg1: memref<3xf32, #tpu.memory_space<smem>>) -> (i32, i32, i32) {
    %c0_i32 = arith.constant 0 : i32
    %c0_i32_0 = arith.constant 0 : i32
    %c0_i32_1 = arith.constant 0 : i32
    return %c0_i32, %arg0, %c0_i32_0 : i32, i32, i32
  }
  func.func @transform_1(%arg0: i32, %arg1: memref<3xf32, #tpu.memory_space<smem>>) -> (i32, i32, i32) {
    %c0_i32 = arith.constant 0 : i32
    %c0_i32_0 = arith.constant 0 : i32
    %c0_i32_1 = arith.constant 0 : i32
    return %c0_i32, %arg0, %c0_i32_0 : i32, i32, i32
  }
}

</mosaic_0001>

<bundles_post_ra>
// kernel: lorenz63_forward.1
= control target key start
LH: loop header
LB: loop body
LE: loop exit
PB: predicated region body
PF: predicated region fallthrough
CT: control target
= control target key end

     0   :  { %s101_s0 = inlined_call_operand.vmem [shape: f32[3], index: 0, kind: input, shape index: {}]   ;;  %s102_s1 = inlined_call_operand.vmem [shape: f32[3,8,128], index: 1, kind: input, shape index: {}]   ;;  %s103_s2 = inlined_call_operand.vmem [shape: f32[3,8,128], index: 2, kind: output, shape index: {}]  }
   0x1   :  { %s7_s11 = sshll.u32 %s101_s0, 4  ;;  %s8_s11 = int_to_ptr.vmem [resolvable:$true] %s7_s11 }
   0x2   :  { %s50_s12 = scalar_lea.vmem %s8_s11, 16  ;;  %p55_p1 = scmp.lt.s32.totalorder %s8_s11, %s8_s11 }
   0x3   :  { %p51_p0 = scmp.ne.s32.totalorder %s8_s11, %s50_s12  ;;  %p56_p2 = scmp.lt.s32.totalorder %s50_s12, %s50_s12 }
   0x5   :  { %p57_p3 = por %p56_p2, %p55_p1 }
   0x7   :  { %p58_p4 = pnand %p57_p3, %p51_p0 }
   0x9   :  { %61 = shalt.err (!%p58_p4)  }
   0xa   :  { %s64_s13 = smov [#allocation3]  }
   0xb   :  { %10 = dma.vmem_to_smem %s8_s11, 16, %s64_s13, [#allocation2] }
   0xc   :  { %62 = dma.done.wait [#allocation2], 16 }
   0xd   :  { %63 = vsyncadd [#allocation2], 4294967280 }
   0xe   :  { %12 = sfence }
   0xf   :  { %s15_s14 = sld [smem:[#allocation3]]  ;;  %v18_v0 = vld [vmem:[%s102_s1] sm:$0xff]  ;;  %v45_v1 = vld [vmem:[%s102_s1 + $0x8] sm:$0xff]  ;;  %s43_s18 = sld [smem:[#allocation3 + $0x1]]  ;;  %v46_v3 = vld [vmem:[%s102_s1 + $0x10] sm:$0xff] }
  0x10   :  { %s44_s19 = sld [smem:[#allocation3 + $0x2]]  ;;  %v23_v2 = vsub.f32 %v45_v1, %v18_v0  ;;  %v33_v6 = vmul.f32 %v45_v1, %v18_v0 }
  0x15   :  { %v24_v4 = vstv %s15_s14  ;;  %v27_v5 = vstv %s43_s18 }
  0x16   :  { %v25_v7 = vmul.f32 %v24_v4, %v23_v2  ;;  %v28_v8 = vsub.f32 %v27_v5, %v46_v3  ;;  %v34_v9 = vstv %s44_s19 }
  0x17   :  { %v35_v10 = vmul.f32 %v46_v3, %v34_v9 }
  0x18   :  { %26 = vst [vmem:[%s103_s2] sm:$0xff] %v25_v7  ;;  %v29_v11 = vmul.f32 %v28_v8, %v18_v0 }
  0x19   :  { %v36_v12 = vsub.f32 %v33_v6, %v35_v10 }
  0x1a   :  { %v30_v13 = vsub.f32 %v29_v11, %v45_v1 }
  0x1b   :  { %48 = vst [vmem:[%s103_s2 + $0x10] sm:$0xff] %v36_v12 }
  0x1c   :  { %47 = vst [vmem:[%s103_s2 + $0x8] sm:$0xff] %v30_v13 }

</bundles_post_ra>
